<compile_context>
chip_gen: v7x
topology: tpu7x:2x2x1
jax: 0.10.0
libtpu: 0.0.40
codegen_flags: <defaults>
</compile_context>

<pallas_src>
import math

import jax
import jax.numpy as jnp
from jax import lax
from jax.experimental import pallas as pl
from jax.experimental.pallas import tpu as pltpu

# ----------------------------- configuration --------------------------------
BATCH = 2
SEQ = 8
D_MODEL = 32
D_HIDDEN = 4 * D_MODEL


def _round_up(a: int, b: int) -> int:
    return ((a + b - 1) // b) * b


def _gelu_exact(x):
    # matches torch.nn.GELU() (erf-based, non-approximate)
    return 0.5 * x * (1.0 + lax.erf(x * (1.0 / math.sqrt(2.0))))


# ------------------------------- kernel --------------------------------------
def mlp_kernel(x_ref, w_fc_ref, w_proj_ref, bias_ref, o_ref):
    # x_ref:      (tm, Dp)        one M tile, lane-dense (Dp % 128 == 0)
    # w_fc_ref:   (Dp, Hp)        resident across all M tiles
    # w_proj_ref: (Hp, Dp)        resident across all M tiles
    # bias_ref:   (1, Hp + Dp)    [b_fc | b_proj], f32, resident
    # o_ref:      (tm, Dp)
    hp = w_fc_ref.shape[1]

    x = x_ref[...]

    # c_fc: (tm, Dp) @ (Dp, Hp) -> (tm, Hp), f32 accumulation on the MXU
    h = jnp.dot(x, w_fc_ref[...], preferred_element_type=jnp.float32)
    h = h + bias_ref[:, :hp]              # (1, Hp) broadcasts over rows
    h = _gelu_exact(h)

    # c_proj: (tm, Hp) @ (Hp, Dp) -> (tm, Dp), f32 accumulation on the MXU.
    # (.astype is a no-op for f32 weights; single cast when weights are bf16)
    y = jnp.dot(h.astype(w_proj_ref.dtype), w_proj_ref[...],
                preferred_element_type=jnp.float32)
    y = y + bias_ref[:, hp:]              # (1, Dp)

    # unmasked full-lane store of the whole tile
    o_ref[...] = y.astype(o_ref.dtype)


# ------------------------------ wrapper ---------------------------------------
def mlp_forward(x, params, *, tile_m: int = 256):
    B, S, D = x.shape
    w_fc, b_fc = params["w_fc"], params["b_fc"]          # (D, 4D), (4D,)
    w_proj, b_proj = params["w_proj"], params["b_proj"]  # (4D, D), (D,)
    H = w_fc.shape[1]

    M = B * S
    # lane-dense padding (multiples of 128) and sublane-aligned M tile
    Dp = _round_up(D, 128)
    Hp = _round_up(H, 128)
    tm = min(tile_m, _round_up(M, 8))
    Mp = _round_up(M, tm)

    x2 = x.reshape(M, D)
    if (Mp, Dp) != (M, D):
        x2 = jnp.pad(x2, ((0, Mp - M), (0, Dp - D)))
    if (Dp, Hp) != (D, H):
        w_fc = jnp.pad(w_fc, ((0, Dp - D), (0, Hp - H)))
        w_proj = jnp.pad(w_proj, ((0, Hp - H), (0, Dp - D)))

    # single bias buffer: [b_fc (Hp) | b_proj (Dp)] -> one DMA instead of two
    bias = jnp.concatenate([
        jnp.pad(b_fc.astype(jnp.float32), (0, Hp - H)),
        jnp.pad(b_proj.astype(jnp.float32), (0, Dp - D)),
    ]).reshape(1, Hp + Dp)

    # explicit VMEM budget: weights (default double-buffered even though the
    # constant index_map DMAs them once), double-buffered x/out tiles, biases,
    # and the f32 hidden activation, with 2x headroom.
    w_bytes = w_fc.dtype.itemsize
    x_bytes = x.dtype.itemsize
    vmem_needed = (
        2 * tm * Dp * x_bytes                    # x tiles (double-buffered)
        + 2 * tm * Dp * x_bytes                  # out tiles (double-buffered)
        + 2 * (Dp * Hp + Hp * Dp) * w_bytes      # resident weights
        + 2 * (Hp + Dp) * 4                      # bias buffer
        + tm * Hp * 4                            # f32 hidden activation
    )
    vmem_limit = int(min(100 * 1024 * 1024,
                         max(32 * 1024 * 1024, 2 * vmem_needed)))

    out = pl.pallas_call(
        mlp_kernel,
        out_shape=jax.ShapeDtypeStruct((Mp, Dp), x.dtype),
        grid=(Mp // tm,),
        in_specs=[
            pl.BlockSpec((tm, Dp), lambda i: (i, 0)),       # x: tiled over M
            pl.BlockSpec((Dp, Hp), lambda i: (0, 0)),       # w_fc: resident
            pl.BlockSpec((Hp, Dp), lambda i: (0, 0)),       # w_proj: resident
            pl.BlockSpec((1, Hp + Dp), lambda i: (0, 0)),   # biases: resident
        ],
        out_specs=pl.BlockSpec((tm, Dp), lambda i: (i, 0)),
        compiler_params=pltpu.CompilerParams(
            dimension_semantics=("parallel",),   # shards M tiles across TCs (v7x)
            vmem_limit_bytes=vmem_limit,
        ),
    )(x2, w_fc, w_proj, bias)

    return out[:M, :D].reshape(B, S, D)


# ------------------------- pure-JAX reference ---------------------------------
def mlp_reference(x, params):
    h = x @ params["w_fc"] + params["b_fc"]
    h = 0.5 * h * (1.0 + lax.erf(h / math.sqrt(2.0)))
    return h @ params["w_proj"] + params["b_proj"]


# --------------------------------- main ----------------------------------------
if __name__ == "__main__":
    key = jax.random.PRNGKey(0)
    k_wfc, k_bfc, k_wpr, k_bpr, k_x = jax.random.split(key, 5)

    def init_linear(kw, kb, fan_in, fan_out):
        # deterministic init mirroring nn.Linear's uniform(-1/sqrt(fan_in), ...)
        bound = 1.0 / math.sqrt(fan_in)
        w = jax.random.uniform(kw, (fan_in, fan_out), jnp.float32, -bound, bound)
        b = jax.random.uniform(kb, (fan_out,), jnp.float32, -bound, bound)
        return w, b

    # weights stored pre-transposed to (in_features, out_features): x @ W + b
    w_fc, b_fc = init_linear(k_wfc, k_bfc, D_MODEL, D_HIDDEN)
    w_proj, b_proj = init_linear(k_wpr, k_bpr, D_HIDDEN, D_MODEL)

    params = dict(w_fc=w_fc, b_fc=b_fc, w_proj=w_proj, b_proj=b_proj)

    x = jax.random.normal(k_x, (BATCH, SEQ, D_MODEL), jnp.float32)

    out = jax.block_until_ready(mlp_forward(x, params))
    ref = mlp_reference(x, params)

    assert out.shape == (BATCH, SEQ, D_MODEL)
    assert jnp.allclose(out, ref, atol=1e-4, rtol=1e-4), (
        f"max abs err = {jnp.max(jnp.abs(out - ref))}")

    print("KERNEL_OK")
</pallas_src>

<mosaic_0001>
module attributes {stable_mosaic.version = 11 : i64} {
  func.func @mlp_kernel(%arg0: i32, %arg1: memref<16x128xf32, #tpu.memory_space<vmem>>, %arg2: memref<128x128xf32, #tpu.memory_space<vmem>>, %arg3: memref<128x128xf32, #tpu.memory_space<vmem>>, %arg4: memref<1x256xf32, #tpu.memory_space<vmem>>, %arg5: memref<16x128xf32, #tpu.memory_space<vmem>>) attributes {dimension_semantics = [#tpu.dimension_semantics<parallel>], iteration_bounds = array<i64: 1>, scalar_prefetch = 0 : i64, scratch_operands = 0 : i64, tpu.core_type = #tpu.core_type<tc>, window_params = [{transform_indices = @transform_0, window_bounds = array<i64: 16, 128>}, {pipeline_mode = #tpu.pipeline_mode<synchronous>, transform_indices = @transform_1, window_bounds = array<i64: 128, 128>}, {pipeline_mode = #tpu.pipeline_mode<synchronous>, transform_indices = @transform_2, window_bounds = array<i64: 128, 128>}, {pipeline_mode = #tpu.pipeline_mode<synchronous>, transform_indices = @transform_3, window_bounds = array<i64: 1, 256>}, {transform_indices = @transform_4, window_bounds = array<i64: 16, 128>}]} {
    %c0 = arith.constant 0 : index
    %c0_0 = arith.constant 0 : index
    %0 = vector.load %arg1[%c0, %c0_0] : memref<16x128xf32, #tpu.memory_space<vmem>>, vector<16x128xf32>
    %c0_1 = arith.constant 0 : index
    %c0_2 = arith.constant 0 : index
    %1 = vector.load %arg2[%c0_1, %c0_2] : memref<128x128xf32, #tpu.memory_space<vmem>>, vector<128x128xf32>
    %cst = arith.constant dense<0.000000e+00> : vector<16x128xf32>
    %2 = tpu.matmul %0, %1, %cst {dimension_numbers = #tpu.dot_dimension_numbers<[1], [0], [0], [1], [0, 0, 1, 1], [], []>} : vector<16x128xf32>, vector<128x128xf32>, vector<16x128xf32> -> vector<16x128xf32>
    %c0_3 = arith.constant 0 : index
    %c0_4 = arith.constant 0 : index
    %3 = vector.load %arg4[%c0_3, %c0_4] : memref<1x256xf32, #tpu.memory_space<vmem>>, vector<1x128xf32>
    %4 = vector.broadcast %3 : vector<1x128xf32> to vector<16x128xf32>
    %5 = arith.addf %2, %4 : vector<16x128xf32>
    %cst_5 = arith.constant 5.000000e-01 : f32
    %6 = vector.broadcast %cst_5 : f32 to vector<16x128xf32>
    %7 = arith.mulf %6, %5 : vector<16x128xf32>
    %cst_6 = arith.constant 0.707106769 : f32
    %8 = vector.broadcast %cst_6 : f32 to vector<16x128xf32>
    %9 = arith.mulf %5, %8 : vector<16x128xf32>
    %10 = math.erf %9 : vector<16x128xf32>
    %cst_7 = arith.constant 1.000000e+00 : f32
    %11 = vector.broadcast %cst_7 : f32 to vector<16x128xf32>
    %12 = arith.addf %11, %10 : vector<16x128xf32>
    %13 = arith.mulf %7, %12 : vector<16x128xf32>
    %c0_8 = arith.constant 0 : index
    %c0_9 = arith.constant 0 : index
    %14 = vector.load %arg3[%c0_8, %c0_9] : memref<128x128xf32, #tpu.memory_space<vmem>>, vector<128x128xf32>
    %cst_10 = arith.constant dense<0.000000e+00> : vector<16x128xf32>
    %15 = tpu.matmul %13, %14, %cst_10 {dimension_numbers = #tpu.dot_dimension_numbers<[1], [0], [0], [1], [0, 0, 1, 1], [], []>} : vector<16x128xf32>, vector<128x128xf32>, vector<16x128xf32> -> vector<16x128xf32>
    %c0_11 = arith.constant 0 : index
    %c128 = arith.constant 128 : index
    %16 = vector.load %arg4[%c0_11, %c128] : memref<1x256xf32, #tpu.memory_space<vmem>>, vector<1x128xf32>
    %17 = vector.broadcast %16 : vector<1x128xf32> to vector<16x128xf32>
    %18 = arith.addf %15, %17 : vector<16x128xf32>
    %c0_12 = arith.constant 0 : index
    %c0_13 = arith.constant 0 : index
    %19 = vector.load %arg5[%c0_12, %c0_13] : memref<16x128xf32, #tpu.memory_space<vmem>>, vector<16x128xf32>
    tpu.vector_store %arg5[%c0_12, %c0_13], %18 {strides = array<i32>} : memref<16x128xf32, #tpu.memory_space<vmem>>, vector<16x128xf32>,
    return
  }
  func.func @transform_0(%arg0: i32) -> (i32, i32) {
    %c0_i32 = arith.constant 0 : i32
    %c0_i32_0 = arith.constant 0 : i32
    return %arg0, %c0_i32 : i32, i32
  }
  func.func @transform_1(%arg0: i32) -> (i32, i32) {
    %c0_i32 = arith.constant 0 : i32
    %c0_i32_0 = arith.constant 0 : i32
    %c0_i32_1 = arith.constant 0 : i32
    return %c0_i32, %c0_i32_0 : i32, i32
  }
  func.func @transform_2(%arg0: i32) -> (i32, i32) {
    %c0_i32 = arith.constant 0 : i32
    %c0_i32_0 = arith.constant 0 : i32
    %c0_i32_1 = arith.constant 0 : i32
    return %c0_i32, %c0_i32_0 : i32, i32
  }
  func.func @transform_3(%arg0: i32) -> (i32, i32) {
    %c0_i32 = arith.constant 0 : i32
    %c0_i32_0 = arith.constant 0 : i32
    %c0_i32_1 = arith.constant 0 : i32
    return %c0_i32, %c0_i32_0 : i32, i32
  }
  func.func @transform_4(%arg0: i32) -> (i32, i32) {
    %c0_i32 = arith.constant 0 : i32
    %c0_i32_0 = arith.constant 0 : i32
    return %arg0, %c0_i32 : i32, i32
  }
}

</mosaic_0001>

<bundles_post_ra>
// kernel: tpu_custom_call.1
= control target key start
LH: loop header
LB: loop body
LE: loop exit
PB: predicated region body
PF: predicated region fallthrough
CT: control target
= control target key end

     0   :  { %9 = vsyncpa [#allocation3], 0  ;;  %s667_s0 = inlined_call_operand.hbm [shape: f32[16,128], index: 0, kind: input, shape index: {}]   ;;  %s668_s1 = inlined_call_operand.hbm [shape: f32[128,128], index: 1, kind: input, shape index: {}]   ;;  %s669_s2 = inlined_call_operand.hbm [shape: f32[128,128], index: 2, kind: input, shape index: {}]   ;;  %s670_s3 = inlined_call_operand.vmem [shape: f32[1,256], index: 3, kind: input, shape index: {}]   ;;  %s671_s4 = inlined_call_operand.hbm [shape: f32[16,128], index: 4, kind: output, shape index: {}]  }
   0x1   :  { %10 = vsyncpa [#allocation6], 0 }
   0x2   :  { %11 = vsyncpa [#allocation4], 0  ;;  %s563_s15 = smov [#allocation5]   ;;  %s564_s17 = smov [#allocation2]  }
   0x3   :  { %s29_s16 = sshll.u32 %s563_s15, 4  ;;  %s17_s18 = sshll.u32 %s564_s17, 4  ;;  %s30_s16 = int_to_ptr.vmem [resolvable:$true] %s29_s16  ;;  %s594_s18 = int_to_ptr.vmem [resolvable:$true] %s17_s18 }
   0x4   :  { %s469_s21 = scalar_lea.hbm %s668_s1, 2048 }
   0x5   :  { %p470_p0 = scmp.ne.s32.totalorder %s668_s1, %s469_s21  ;;  %p473_p1 = scmp.lt.u32.totalorder %s469_s21, %s668_s1 }
   0x7   :  { %p475_p2 = pnand %p473_p1, %p470_p0 }
   0x9   :  { %478 = shalt.err (!%p475_p2)
}
   0xa   :  { %s479_s26 = scalar_lea.vmem %s30_s16, 2048  ;;  %p484_p4 = scmp.lt.s32.totalorder %s30_s16, %s30_s16 }
   0xb   :  { %p480_p3 = scmp.ne.s32.totalorder %s30_s16, %s479_s26  ;;  %p485_p5 = scmp.lt.s32.totalorder %s479_s26, %s479_s26 }
   0xd   :  { %p486_p6 = por %p485_p5, %p484_p4 }
   0xf   :  { %p487_p7 = pnand %p486_p6, %p480_p3 }
  0x11   :  { %490 = shalt.err (!%p487_p7)
}
  0x12   :  { %s565_s27 = smov 128   ;;  %s566_s28 = smov 8  }
  0x13   :  { %35 = dma.hbm_to_vmem [thread:$0]  %s668_s1, 2048, %s30_s16, [#allocation6], %s565_s27, %s565_s27, %s566_s28  }
  0x14   :  { %s491_s7 = scalar_lea.hbm %s667_s0, 256 }
  0x15   :  { %p492_p8 = scmp.ne.s32.totalorder %s667_s0, %s491_s7  ;;  %p495_p9 = scmp.lt.u32.totalorder %s491_s7, %s667_s0 }
  0x17   :  { %p497_p10 = pnand %p495_p9, %p492_p8 }
  0x19   :  { %500 = shalt.err (!%p497_p10)
}
  0x1a   :  { %s501_s12 = scalar_lea.vmem %s594_s18, 256  ;;  %p506_p12 = scmp.lt.s32.totalorder %s594_s18, %s594_s18 }
  0x1b   :  { %p502_p11 = scmp.ne.s32.totalorder %s594_s18, %s501_s12  ;;  %p507_p13 = scmp.lt.s32.totalorder %s501_s12, %s501_s12 }
  0x1d   :  { %p508_p0 = por %p507_p13, %p506_p12 }
  0x1f   :  { %p509_p1 = pnand %p508_p0, %p502_p11 }
  0x21   :  { %512 = shalt.err (!%p509_p1)
}
  0x22   :  { %23 = dma.hbm_to_vmem [thread:$0]  %s667_s0, 256, %s594_s18, [#allocation3], %s565_s27, %s565_s27, %s566_s28  }
  0x23   :  { %s567_s14 = smov [#allocation7]   ;;  %s513_s19 = scalar_lea.hbm %s669_s2, 2048 }
  0x24   :  { %s41_s15 = sshll.u32 %s567_s14, 4  ;;  %p514_p2 = scmp.ne.s32.totalorder %s669_s2, %s513_s19  ;;  %s42_s15 = int_to_ptr.vmem [resolvable:$true] %s41_s15 }
  0x25   :  { %p517_p3 = scmp.lt.u32.totalorder %s513_s19, %s669_s2 }
  0x27   :  { %p519_p4 = pnand %p517_p3, %p514_p2 }
  0x29   :  { %522 = shalt.err (!%p519_p4)
}
  0x2a   :  { %s523_s24 = scalar_lea.vmem %s42_s15, 2048  ;;  %p528_p6 = scmp.lt.s32.totalorder %s42_s15, %s42_s15 }
  0x2b   :  { %p524_p5 = scmp.ne.s32.totalorder %s42_s15, %s523_s24  ;;  %p529_p7 = scmp.lt.s32.totalorder %s523_s24, %s523_s24 }
  0x2d   :  { %p530_p8 = por %p529_p7, %p528_p6 }
  0x2f   :  { %p531_p9 = pnand %p530_p8, %p524_p5 }
  0x31   :  { %534 = shalt.err (!%p531_p9)
}
  0x32   :  { %47 = dma.hbm_to_vmem [thread:$0]  %s669_s2, 2048, %s42_s15, [#allocation6], %s565_s27, %s565_s27, %s566_s28  }
  0x33   :  { %557 = dma.done.wait [#allocation3], 256  }
  0x34   :  { %558 = vsyncadd [#allocation3], 4294967040 }
  0x35   :  { %559 = dma.done.wait [#allocation6], 4096  }
  0x36   :  { %560 = vsyncadd [#allocation6], 4294963200  ;;  %v61_v0 = vld [vmem:[#allocation5] sm:$0xff]  ;;  %v62_v1 = vld [vmem:[#allocation5 + $0x8] sm:$0xff]  ;;  %s568_s30 = smov [#allocation8]  }
  0x37   :  { %v63_v2 = vld [vmem:[#allocation5 + $0x10] sm:$0xff]  ;;  %v395_v3 = vpack.c.bf16 %v62_v1, %v61_v0  ;;  %v64_v4 = vld [vmem:[#allocation5 + $0x18] sm:$0xff]  ;;  %v65_v6 = vld [vmem:[#allocation5 + $0x20] sm:$0xff]  ;;  %s274_s5 = sshll.u32 %s568_s30, 4  ;;  %s275_s5 = int_to_ptr.vmem [resolvable:$true] %s274_s5 }
  0x38   :  { %v399_v5 = vpack.c.bf16 %v64_v4, %v63_v2  ;;  %v66_v7 = vld [vmem:[#allocation5 + $0x28] sm:$0xff]  ;;  %v67_v9 = vld [vmem:[#allocation5 + $0x30] sm:$0xff]  ;;  %v68_v10 = vld [vmem:[#allocation5 + $0x38] sm:$0xff]  ;;  %s535_s6 = scalar_lea.vmem %s275_s5, 256  ;;  %p540_p11 = scmp.lt.s32.totalorder %s275_s5, %s275_s5 }
  0x39   :  { %396 = vmatprep.subr.bf16.mxu0 %v395_v3  ;;  %v403_v8 = vpack.c.bf16 %v66_v7, %v65_v6  ;;  %v59_v11 = vld [vmem:[#allocation2] sm:$0xff]  ;;  %v169_v12 = vld [vmem:[#allocation7] sm:$0xff]  ;;  %v170_v13 = vld [vmem:[#allocation7 + $0x8] sm:$0xff]  ;;  %v407_v20 = vpack.c.bf16 %v68_v10, %v67_v9  ;;  %p536_p10 = scmp.ne.s32.totalorder %s275_s5, %s535_s6  ;;  %p541_p12 = scmp.lt.s32.totalorder %s535_s6, %s535_s6 }
  0x3a   :  { %398 = vmatpush3.bf16.msra.mxu0 %v395_v3  ;;  %357 = vmatprep.mubr.f32.mxu0 %v59_v11  ;;  %v171_v14 = vld [vmem:[#allocation7 + $0x10] sm:$0xff]  ;;  %v427_v15 = vpack.c.bf16 %v170_v13, %v169_v12  ;;  %v172_v16 = vld [vmem:[#allocation7 + $0x18] sm:$0xff]  ;;  %v173_v18 = vld [vmem:[#allocation7 + $0x20] sm:$0xff] }
  0x3b   :  { %400 = vmatprep.subr.bf16.mxu0 %v399_v5  ;;  %v431_v17 = vpack.c.bf16 %v172_v16, %v171_v14  ;;  %v174_v19 = vld [vmem:[#allocation7 + $0x28] sm:$0xff]  ;;  %v69_v21 = vld [vmem:[#allocation5 + $0x40] sm:$0xff]  ;;  %v71_v25 = vld [vmem:[#allocation5 + $0x50] sm:$0xff]  ;;  %p542_p13 = por %p541_p12, %p540_p11 }
  0x3c   :  { %428 = vmatprep.subr.bf16.mxu1 %v427_v15  ;;  %v70_v22 = vld [vmem:[#allocation5 + $0x48] sm:$0xff]  ;;  %v435_v23 = vpack.c.bf16 %v174_v19, %v173_v18  ;;  %v72_v26 = vld [vmem:[#allocation5 + $0x58] sm:$0xff]  ;;  %v73_v28 = vld [vmem:[#allocation5 + $0x60] sm:$0xff] }
  0x3d   :  { %430 = vmatpush3.bf16.msra.mxu1 %v427_v15  ;;  %v411_v24 = vpack.c.bf16 %v70_v22, %v69_v21  ;;  %v415_v27 = vpack.c.bf16 %v72_v26, %v71_v25  ;;  %v74_v29 = vld [vmem:[#allocation5 + $0x68] sm:$0xff]  ;;  %v75_v31 = vld [vmem:[#allocation5 + $0x70] sm:$0xff]  ;;  %v76_v32 = vld [vmem:[#allocation5 + $0x78] sm:$0xff]  ;;  %p543_p0 = pnand %p542_p13, %p536_p10 }
  0x3e   :  { %402 = vmatpush3.bf16.msra.mxu0 %v399_v5  ;;  %432 = vmatprep.subr.bf16.mxu1 %v431_v17  ;;  %v419_v30 = vpack.c.bf16 %v74_v29, %v73_v28  ;;  %v423_v33 = vpack.c.bf16 %v76_v32, %v75_v31  ;;  %v60_v34 = vld [vmem:[#allocation2 + $0x8] sm:$0xff]  ;;  %v175_v35 = vld [vmem:[#allocation7 + $0x30] sm:$0xff]  ;;  %v177_v38 = vld [vmem:[#allocation7 + $0x40] sm:$0xff] }
  0x3f   :  { %404 = vmatprep.subr.bf16.mxu0 %v403_v8  ;;  %v176_v36 = vld [vmem:[#allocation7 + $0x38] sm:$0xff]  ;;  %v178_v39 = vld [vmem:[#allocation7 + $0x48] sm:$0xff]  ;;  %v179_v41 = vld [vmem:[#allocation7 + $0x50] sm:$0xff] }
  0x40   :  { %v439_v37 = vpack.c.bf16 %v176_v36, %v175_v35  ;;  %v443_v40 = vpack.c.bf16 %v178_v39, %v177_v38  ;;  %v180_v42 = vld [vmem:[#allocation7 + $0x58] sm:$0xff]  ;;  %v181_v44 = vld [vmem:[#allocation7 + $0x60] sm:$0xff]  ;;  %v182_v45 = vld [vmem:[#allocation7 + $0x68] sm:$0xff] }
  0x41   :  { %434 = vmatpush3.bf16.msra.mxu1 %v431_v17  ;;  %v447_v43 = vpack.c.bf16 %v180_v42, %v179_v41  ;;  %v451_v46 = vpack.c.bf16 %v182_v45, %v181_v44  ;;  %v183_v47 = vld [vmem:[#allocation7 + $0x70] sm:$0xff]  ;;  %v184_v48 = vld [vmem:[#allocation7 + $0x78] sm:$0xff] }
  0x42   :  { %406 = vmatpush3.bf16.msra.mxu0 %v403_v8  ;;  %436 = vmatprep.subr.bf16.mxu1 %v435_v23  ;;  %v455_v49 = vpack.c.bf16 %v184_v48, %v183_v47  ;;  %v287_v50 = vld [vmem:[%s670_s3] ss:$0 sm:$0xff]  ;;  %v288_v1 = vld [vmem:[%s670_s3 + $0x1] ss:$0 sm:$0xff] }
  0x43   :  { %408 = vmatprep.subr.bf16.mxu0 %v407_v20 }
  0x45   :  { %438 = vmatpush3.bf16.msra.mxu1 %v435_v23 }
  0x46   :  { %410 = vmatpush3.bf16.msra.mxu0 %v407_v20  ;;  %440 = vmatprep.subr.bf16.mxu1 %v439_v37 }
  0x47   :  { %412 = vmatprep.subr.bf16.mxu0 %v411_v24 }
  0x49   :  { %442 = vmatpush3.bf16.msra.mxu1 %v439_v37 }
  0x4a   :  { %414 = vmatpush3.bf16.msra.mxu0 %v411_v24  ;;  %444 = vmatprep.subr.bf16.mxu1 %v443_v40 }
  0x4b   :  { %416 = vmatprep.subr.bf16.mxu0 %v415_v27 }
  0x4d   :  { %446 = vmatpush3.bf16.msra.mxu1 %v443_v40 }
  0x4e   :  { %418 = vmatpush3.bf16.msra.mxu0 %v415_v27  ;;  %448 = vmatprep.subr.bf16.mxu1 %v447_v43 }
  0x4f   :  { %420 = vmatprep.subr.bf16.mxu0 %v419_v30 }
  0x51   :  { %450 = vmatpush3.bf16.msra.mxu1 %v447_v43 }
  0x52   :  { %422 = vmatpush3.bf16.msra.mxu0 %v419_v30  ;;  %452 = vmatprep.subr.bf16.mxu1 %v451_v46 }
  0x53   :  { %424 = vmatprep.subr.bf16.mxu0 %v423_v33 }
  0x55   :  { %454 = vmatpush3.bf16.msra.mxu1 %v451_v46 }
  0x56   :  { %426 = vmatpush3.bf16.msra.mxu0 %v423_v33  ;;  %456 = vmatprep.subr.bf16.mxu1 %v455_v49 }
  0x59   :  { %358 = vmatmul.mubr.f32.vlgmr.msra.gmra.mrb[0].mxu0 %v60_v34  ;;  %458 = vmatpush3.bf16.msra.mxu1 %v455_v49 }
 0x12c   :  { %v359_v51 = vpop.f32.mrb[0].mxu0 }
 0x12d   :  { %v156_v52 = vadd.f32 %v359_v51, %v287_v50  ;;  %v150_v53 = vpop.f32.mrb[1].mxu0 }
 0x12e   :  { %v151_v54 = vadd.f32 %v287_v50, %v150_v53 }
 0x12f   :  { %v162_v55 = vmul.f32 0.70710677, %v156_v52  ;;  %v160_v62 = vmul.f32 0.5, %v156_v52 }
 0x130   :  { %v161_v56 = vmul.f32 0.70710677, %v151_v54  ;;  %v159_v60 = vmul.f32 0.5, %v151_v54 }
 0x131   :  { %465 = verf.f32 %v162_v55 }
 0x132   :  { %467 = verf.f32 %v161_v56 }
 0x13b   :  { %v466_v57 = vpop.eup %465 }
 0x13c   :  { %v468_v58 = vpop.eup %467  ;;  %v166_v59 = vadd.f32 1.0, %v466_v57 }
 0x13d   :  { %v165_v61 = vadd.f32 1.0, %v468_v58 }
 0x13e   :  { %v168_v0 = vmul.f32 %v166_v59, %v160_v62 }
 0x13f   :  { %v167_v63 = vmul.f32 %v165_v61, %v159_v60 }
 0x141   :  { %392 = vmatprep.mubr.f32.mxu1 %v167_v63 }
 0x142   :  { %393 = vmatmul.mubr.f32.vlgmr.msra.gmra.mrb[0].mxu1 %v168_v0 }
 0x215   :  { %v394_v2 = vpop.f32.mrb[0].mxu1 }
 0x216   :  { %v264_v3 = vadd.f32 %v394_v2, %v288_v1  ;;  %v258_v4 = vpop.f32.mrb[1].mxu1 }
 0x217   :  { %v259_v5 = vadd.f32 %v288_v1, %v258_v4 }
 0x218   :  { %268 = vst [vmem:[#allocation8 + $0x8] sm:$0xff] %v264_v3 }
 0x219   :  { %267 = vst [vmem:[#allocation8] sm:$0xff] %v259_v5 }
 0x21a   :  { %546 = shalt.err (!%p543_p0)
}
 0x21b   :  { %s547_s3 = scalar_lea.hbm %s671_s4, 256 }
 0x21c   :  { %p548_p1 = scmp.ne.s32.totalorder %s671_s4, %s547_s3  ;;  %p551_p2 = scmp.lt.u32.totalorder %s547_s3, %s671_s4 }
 0x21e   :  { %p553_p3 = pnand %p551_p2, %p548_p1 }
 0x220   :  { %556 = shalt.err (!%p553_p3)
}
 0x221   :  { %280 = dma.vmem_to_hbm [thread:$0]  %s275_s5, 256, %s671_s4, [#allocation4], %s565_s27, %s565_s27, %s566_s28  }
 0x222   :  { %561 = dma.done.wait [#allocation4], 256  }
 0x223   :  { %562 = vsyncadd [#allocation4], 4294967040 }
 0x224   :  { %284 = vsyncpa [#allocation3], 1 }
 0x225   :  { %285 = vsyncpa [#allocation6], 1 }
 0x226   :  { %286 = vsyncpa [#allocation4], 1 }

</bundles_post_ra>
